<compile_context>
chip_gen: v7x
topology: tpu7x:2x2x1
jax: 0.10.0
libtpu: 0.0.40
codegen_flags: <defaults>
</compile_context>

<pallas_src>
import functools

import jax
import jax.numpy as jnp
from jax.experimental import pallas as pl
from jax.experimental.pallas import tpu as pltpu

SIGMA_MAX = 2.0
SIGMA_MIN = -20.0
_LANE = 128  # TPU lane width; fused head output is padded to a multiple of this


def _policy_kernel(x_ref, w1_ref, b1_ref, w2_ref, b2_ref, wh_ref, bh_ref,
                   out_ref, *, num_actions):
    x = x_ref[...]

    # fc1 + ReLU
    h1 = jnp.dot(x, w1_ref[...], preferred_element_type=jnp.float32) + b1_ref[...]
    h1 = jnp.maximum(h1, 0.0)

    # fc2 + ReLU
    h2 = jnp.dot(h1, w2_ref[...], preferred_element_type=jnp.float32) + b2_ref[...]
    h2 = jnp.maximum(h2, 0.0)

    # Fused [mu | sigma | zero-pad] head: one MXU push, one lane-dense store.
    head = jnp.dot(h2, wh_ref[...], preferred_element_type=jnp.float32) + bh_ref[...]

    # Clamp only the sigma columns [num_actions, 2*num_actions).
    col = jax.lax.broadcasted_iota(jnp.int32, head.shape, 1)
    is_sigma = (col >= num_actions) & (col < 2 * num_actions)
    head = jnp.where(is_sigma, jnp.clip(head, SIGMA_MIN, SIGMA_MAX), head)

    out_ref[...] = head.astype(out_ref.dtype)


def prepare_params(params):
    """One-time parameter conversion. Call OUTSIDE the per-step hot path.

    Converts PyTorch-convention (out, in) weights to (in, out), fuses the
    mu/sigma heads into a single lane-padded weight, and reshapes biases to
    (1, out) for clean 2-D broadcasting inside the kernel.
    """
    w1, b1, w2, b2, wmu, bmu, wsig, bsig = params
    hidden = w1.shape[0]
    num_actions = wmu.shape[0]
    head_out = max(_LANE, ((2 * num_actions + _LANE - 1) // _LANE) * _LANE)
    pad = head_out - 2 * num_actions

    w_head = jnp.concatenate([wmu, wsig], axis=0).T.astype(jnp.float32)  # (hidden, 2A)
    b_head = jnp.concatenate([bmu, bsig], axis=0).astype(jnp.float32)    # (2A,)
    w_head = jnp.pad(w_head, ((0, 0), (0, pad)))                          # (hidden, head_out)
    b_head = jnp.pad(b_head, (0, pad))                                    # (head_out,)

    return {
        "w1_t": w1.T.astype(jnp.float32),                 # (num_inputs, hidden)
        "b1": b1.reshape(1, hidden).astype(jnp.float32),
        "w2_t": w2.T.astype(jnp.float32),                 # (hidden, hidden)
        "b2": b2.reshape(1, hidden).astype(jnp.float32),
        "w_head": w_head,                                  # (hidden, head_out)
        "b_head": b_head.reshape(1, head_out),
        "num_actions": num_actions,                        # python int (static)
    }


def gaussian_policy_forward(state, prepared, *, block_batch=256):
    """Fused forward pass. Returns (mu, sigma_clamped) matching PyTorch semantics."""
    w1_t, b1 = prepared["w1_t"], prepared["b1"]
    w2_t, b2 = prepared["w2_t"], prepared["b2"]
    w_head, b_head = prepared["w_head"], prepared["b_head"]
    num_actions = int(prepared["num_actions"])

    batch, num_inputs = state.shape
    hidden = w1_t.shape[1]
    head_out = w_head.shape[1]

    state = state.astype(jnp.float32)

    # Batch tiling: a single full block for small batches, otherwise tiles of
    # `block_batch` rows (multiple of 8) with zero-padding on the last tile.
    if batch <= block_batch:
        tb = batch
        padded_batch = batch
    else:
        assert block_batch % 8 == 0, "block_batch must be a multiple of 8"
        tb = block_batch
        padded_batch = pl.cdiv(batch, tb) * tb
        if padded_batch != batch:
            state = jnp.pad(state, ((0, padded_batch - batch), (0, 0)))
    grid = (padded_batch // tb,)

    kernel = functools.partial(_policy_kernel, num_actions=num_actions)

    out = pl.pallas_call(
        kernel,
        grid=grid,
        in_specs=[
            pl.BlockSpec((tb, num_inputs), lambda i: (i, 0)),      # state tile (pipelined)
            pl.BlockSpec((num_inputs, hidden), lambda i: (0, 0)),  # w1  (VMEM-resident)
            pl.BlockSpec((1, hidden), lambda i: (0, 0)),           # b1
            pl.BlockSpec((hidden, hidden), lambda i: (0, 0)),      # w2
            pl.BlockSpec((1, hidden), lambda i: (0, 0)),           # b2
            pl.BlockSpec((hidden, head_out), lambda i: (0, 0)),    # fused mu|sigma W
            pl.BlockSpec((1, head_out), lambda i: (0, 0)),         # fused mu|sigma b
        ],
        out_specs=pl.BlockSpec((tb, head_out), lambda i: (i, 0)),
        out_shape=jax.ShapeDtypeStruct((padded_batch, head_out), jnp.float32),
        compiler_params=pltpu.CompilerParams(
            dimension_semantics=("parallel",)),  # batch axis -> 2 TCs on v7x
    )(state, w1_t, b1, w2_t, b2, w_head, b_head)

    mu = out[:batch, :num_actions]
    sigma = out[:batch, num_actions:2 * num_actions]
    return mu, sigma


def init_params(key, num_inputs, num_actions, hidden_dim):
    """Deterministic Xavier-uniform init (matches weights_init_ convention)."""
    def xavier(k, out_dim, in_dim):
        limit = (6.0 / (in_dim + out_dim)) ** 0.5
        return jax.random.uniform(k, (out_dim, in_dim), jnp.float32, -limit, limit)

    ks = jax.random.split(key, 4)
    w1 = xavier(ks[0], hidden_dim, num_inputs)
    b1 = jnp.zeros((hidden_dim,), jnp.float32)
    w2 = xavier(ks[1], hidden_dim, hidden_dim)
    b2 = jnp.zeros((hidden_dim,), jnp.float32)
    wmu = xavier(ks[2], num_actions, hidden_dim)
    bmu = jnp.zeros((num_actions,), jnp.float32)
    wsig = xavier(ks[3], num_actions, hidden_dim)
    bsig = jnp.zeros((num_actions,), jnp.float32)
    return (w1, b1, w2, b2, wmu, bmu, wsig, bsig)


def reference_forward(state, params):
    """Pure-JAX reference reproducing the PyTorch forward exactly."""
    w1, b1, w2, b2, wmu, bmu, wsig, bsig = params
    h = jnp.maximum(state @ w1.T + b1, 0.0)
    h = jnp.maximum(h @ w2.T + b2, 0.0)
    mu = h @ wmu.T + bmu
    sig = jnp.clip(h @ wsig.T + bsig, SIGMA_MIN, SIGMA_MAX)
    return mu, sig


if __name__ == "__main__":
    key = jax.random.PRNGKey(0)
    k_state, k_params, k_big = jax.random.split(key, 3)

    batch = 8
    num_inputs = 16
    num_actions = 4
    hidden_dim = 32

    state = jax.random.normal(k_state, (batch, num_inputs), jnp.float32)
    params = init_params(k_params, num_inputs, num_actions, hidden_dim)
    prepared = prepare_params(params)   # one-time cost, outside the hot path

    # Small-batch path (single block, grid=(1,))
    mu, sigma = gaussian_policy_forward(state, prepared)
    jax.block_until_ready((mu, sigma))

    mu_ref, sigma_ref = reference_forward(state, params)
    assert mu.shape == (batch, num_actions) and sigma.shape == (batch, num_actions)
    assert jnp.allclose(mu, mu_ref, atol=1e-5, rtol=1e-5)
    assert jnp.allclose(sigma, sigma_ref, atol=1e-5, rtol=1e-5)

    # Larger, non-tile-aligned batch exercises the pipelined parallel grid path.
    big_batch = 300
    big_state = jax.random.normal(k_big, (big_batch, num_inputs), jnp.float32)
    mu_b, sigma_b = gaussian_policy_forward(big_state, prepared, block_batch=128)
    jax.block_until_ready((mu_b, sigma_b))
    mu_bref, sigma_bref = reference_forward(big_state, params)
    assert mu_b.shape == (big_batch, num_actions)
    assert jnp.allclose(mu_b, mu_bref, atol=1e-5, rtol=1e-5)
    assert jnp.allclose(sigma_b, sigma_bref, atol=1e-5, rtol=1e-5)

    # TODO(synk): `sample()` (rsample / tanh-squash / log_prob) involves host RNG
    # distributions and is not part of forward(); not implemented in-kernel.

    print("KERNEL_OK")
</pallas_src>

<mosaic_0001>
module attributes {stable_mosaic.version = 11 : i64} {
  func.func @_policy_kernel(%arg0: i32, %arg1: memref<8x16xf32, #tpu.memory_space<vmem>>, %arg2: memref<16x32xf32, #tpu.memory_space<vmem>>, %arg3: memref<1x32xf32, #tpu.memory_space<vmem>>, %arg4: memref<32x32xf32, #tpu.memory_space<vmem>>, %arg5: memref<1x32xf32, #tpu.memory_space<vmem>>, %arg6: memref<32x128xf32, #tpu.memory_space<vmem>>, %arg7: memref<1x128xf32, #tpu.memory_space<vmem>>, %arg8: memref<8x128xf32, #tpu.memory_space<vmem>>) attributes {dimension_semantics = [#tpu.dimension_semantics<parallel>], iteration_bounds = array<i64: 1>, scalar_prefetch = 0 : i64, scratch_operands = 0 : i64, tpu.core_type = #tpu.core_type<tc>, window_params = [{transform_indices = @transform_0, window_bounds = array<i64: 8, 16>}, {pipeline_mode = #tpu.pipeline_mode<synchronous>, transform_indices = @transform_1, window_bounds = array<i64: 16, 32>}, {pipeline_mode = #tpu.pipeline_mode<synchronous>, transform_indices = @transform_2, window_bounds = array<i64: 1, 32>}, {pipeline_mode = #tpu.pipeline_mode<synchronous>, transform_indices = @transform_3, window_bounds = array<i64: 32, 32>}, {pipeline_mode = #tpu.pipeline_mode<synchronous>, transform_indices = @transform_4, window_bounds = array<i64: 1, 32>}, {pipeline_mode = #tpu.pipeline_mode<synchronous>, transform_indices = @transform_5, window_bounds = array<i64: 32, 128>}, {pipeline_mode = #tpu.pipeline_mode<synchronous>, transform_indices = @transform_6, window_bounds = array<i64: 1, 128>}, {transform_indices = @transform_7, window_bounds = array<i64: 8, 128>}]} {
    %c0 = arith.constant 0 : index
    %c0_0 = arith.constant 0 : index
    %0 = vector.load %arg1[%c0, %c0_0] : memref<8x16xf32, #tpu.memory_space<vmem>>, vector<8x16xf32>
    %c0_1 = arith.constant 0 : index
    %c0_2 = arith.constant 0 : index
    %1 = vector.load %arg2[%c0_1, %c0_2] : memref<16x32xf32, #tpu.memory_space<vmem>>, vector<16x32xf32>
    %cst = arith.constant dense<0.000000e+00> : vector<8x32xf32>
    %2 = tpu.matmul %0, %1, %cst {dimension_numbers = #tpu.dot_dimension_numbers<[1], [0], [0], [1], [0, 0, 1, 1], [], []>} : vector<8x16xf32>, vector<16x32xf32>, vector<8x32xf32> -> vector<8x32xf32>
    %c0_3 = arith.constant 0 : index
    %c0_4 = arith.constant 0 : index
    %3 = vector.load %arg3[%c0_3, %c0_4] : memref<1x32xf32, #tpu.memory_space<vmem>>, vector<1x32xf32>
    %4 = vector.broadcast %3 : vector<1x32xf32> to vector<8x32xf32>
    %5 = arith.addf %2, %4 : vector<8x32xf32>
    %cst_5 = arith.constant 0.000000e+00 : f32
    %6 = vector.broadcast %cst_5 : f32 to vector<8x32xf32>
    %7 = arith.maximumf %5, %6 : vector<8x32xf32>
    %c0_6 = arith.constant 0 : index
    %c0_7 = arith.constant 0 : index
    %8 = vector.load %arg4[%c0_6, %c0_7] : memref<32x32xf32, #tpu.memory_space<vmem>>, vector<32x32xf32>
    %cst_8 = arith.constant dense<0.000000e+00> : vector<8x32xf32>
    %9 = tpu.matmul %7, %8, %cst_8 {dimension_numbers = #tpu.dot_dimension_numbers<[1], [0], [0], [1], [0, 0, 1, 1], [], []>} : vector<8x32xf32>, vector<32x32xf32>, vector<8x32xf32> -> vector<8x32xf32>
    %c0_9 = arith.constant 0 : index
    %c0_10 = arith.constant 0 : index
    %10 = vector.load %arg5[%c0_9, %c0_10] : memref<1x32xf32, #tpu.memory_space<vmem>>, vector<1x32xf32>
    %11 = vector.broadcast %10 : vector<1x32xf32> to vector<8x32xf32>
    %12 = arith.addf %9, %11 : vector<8x32xf32>
    %cst_11 = arith.constant 0.000000e+00 : f32
    %13 = vector.broadcast %cst_11 : f32 to vector<8x32xf32>
    %14 = arith.maximumf %12, %13 : vector<8x32xf32>
    %c0_12 = arith.constant 0 : index
    %c0_13 = arith.constant 0 : index
    %15 = vector.load %arg6[%c0_12, %c0_13] : memref<32x128xf32, #tpu.memory_space<vmem>>, vector<32x128xf32>
    %cst_14 = arith.constant dense<0.000000e+00> : vector<8x128xf32>
    %16 = tpu.matmul %14, %15, %cst_14 {dimension_numbers = #tpu.dot_dimension_numbers<[1], [0], [0], [1], [0, 0, 1, 1], [], []>} : vector<8x32xf32>, vector<32x128xf32>, vector<8x128xf32> -> vector<8x128xf32>
    %c0_15 = arith.constant 0 : index
    %c0_16 = arith.constant 0 : index
    %17 = vector.load %arg7[%c0_15, %c0_16] : memref<1x128xf32, #tpu.memory_space<vmem>>, vector<1x128xf32>
    %18 = vector.broadcast %17 : vector<1x128xf32> to vector<8x128xf32>
    %19 = arith.addf %16, %18 : vector<8x128xf32>
    %20 = tpu.iota {dimensions = array<i32: 1>} : vector<8x128xi32>
    %c4_i32 = arith.constant 4 : i32
    %21 = vector.broadcast %c4_i32 : i32 to vector<8x128xi32>
    %22 = arith.cmpi sge, %20, %21 : vector<8x128xi32>
    %c8_i32 = arith.constant 8 : i32
    %23 = vector.broadcast %c8_i32 : i32 to vector<8x128xi32>
    %24 = arith.cmpi slt, %20, %23 : vector<8x128xi32>
    %25 = arith.andi %22, %24 : vector<8x128xi1>
    %cst_17 = arith.constant -2.000000e+01 : f32
    %cst_18 = arith.constant 2.000000e+00 : f32
    %26 = vector.broadcast %cst_17 : f32 to vector<8x128xf32>
    %27 = arith.maximumf %26, %19 : vector<8x128xf32>
    %28 = vector.broadcast %cst_18 : f32 to vector<8x128xf32>
    %29 = arith.minimumf %28, %27 : vector<8x128xf32>
    %30 = arith.select %25, %29, %19 : vector<8x128xi1>, vector<8x128xf32>
    %c0_19 = arith.constant 0 : index
    %c0_20 = arith.constant 0 : index
    %31 = vector.load %arg8[%c0_19, %c0_20] : memref<8x128xf32, #tpu.memory_space<vmem>>, vector<8x128xf32>
    tpu.vector_store %arg8[%c0_19, %c0_20], %30 {strides = array<i32>} : memref<8x128xf32, #tpu.memory_space<vmem>>, vector<8x128xf32>,
    return
  }
  func.func @transform_0(%arg0: i32) -> (i32, i32) {
    %c0_i32 = arith.constant 0 : i32
    %c0_i32_0 = arith.constant 0 : i32
    return %arg0, %c0_i32 : i32, i32
  }
  func.func @transform_1(%arg0: i32) -> (i32, i32) {
    %c0_i32 = arith.constant 0 : i32
    %c0_i32_0 = arith.constant 0 : i32
    %c0_i32_1 = arith.constant 0 : i32
    return %c0_i32, %c0_i32_0 : i32, i32
  }
  func.func @transform_2(%arg0: i32) -> (i32, i32) {
    %c0_i32 = arith.constant 0 : i32
    %c0_i32_0 = arith.constant 0 : i32
    %c0_i32_1 = arith.constant 0 : i32
    return %c0_i32, %c0_i32_0 : i32, i32
  }
  func.func @transform_3(%arg0: i32) -> (i32, i32) {
    %c0_i32 = arith.constant 0 : i32
    %c0_i32_0 = arith.constant 0 : i32
    %c0_i32_1 = arith.constant 0 : i32
    return %c0_i32, %c0_i32_0 : i32, i32
  }
  func.func @transform_4(%arg0: i32) -> (i32, i32) {
    %c0_i32 = arith.constant 0 : i32
    %c0_i32_0 = arith.constant 0 : i32
    %c0_i32_1 = arith.constant 0 : i32
    return %c0_i32, %c0_i32_0 : i32, i32
  }
  func.func @transform_5(%arg0: i32) -> (i32, i32) {
    %c0_i32 = arith.constant 0 : i32
    %c0_i32_0 = arith.constant 0 : i32
    %c0_i32_1 = arith.constant 0 : i32
    return %c0_i32, %c0_i32_0 : i32, i32
  }
  func.func @transform_6(%arg0: i32) -> (i32, i32) {
    %c0_i32 = arith.constant 0 : i32
    %c0_i32_0 = arith.constant 0 : i32
    %c0_i32_1 = arith.constant 0 : i32
    return %c0_i32, %c0_i32_0 : i32, i32
  }
  func.func @transform_7(%arg0: i32) -> (i32, i32) {
    %c0_i32 = arith.constant 0 : i32
    %c0_i32_0 = arith.constant 0 : i32
    return %arg0, %c0_i32 : i32, i32
  }
}

</mosaic_0001>

<bundles_post_ra>
// kernel: tpu_custom_call.1
= control target key start
LH: loop header
LB: loop body
LE: loop exit
PB: predicated region body
PF: predicated region fallthrough
CT: control target
= control target key end

     0   :  { %12 = vsyncpa [#allocation3], 0  ;;  %s683_s0 = inlined_call_operand.hbm [shape: f32[8,16], index: 0, kind: input, shape index: {}]   ;;  %s684_s1 = inlined_call_operand.hbm [shape: f32[16,32], index: 1, kind: input, shape index: {}]   ;;  %s685_s2 = inlined_call_operand.vmem [shape: f32[1,32], index: 2, kind: input, shape index: {}]   ;;  %s686_s3 = inlined_call_operand.hbm [shape: f32[32,32], index: 3, kind: input, shape index: {}]   ;;  %s687_s4 = inlined_call_operand.vmem [shape: f32[1,32], index: 4, kind: input, shape index: {}]   ;;  %s688_s5 = inlined_call_operand.hbm [shape: f32[32,128], index: 5, kind: input, shape index: {}]   ;;  %s689_s6 = inlined_call_operand.vmem [shape: f32[1,128], index: 6, kind: input, shape index: {}]   ;;  %s690_s7 = inlined_call_operand.hbm [shape: f32[8,128], index: 7, kind: output, shape index: {}]  }
   0x1   :  { %13 = vsyncpa [#allocation6], 0 }
   0x2   :  { %14 = vsyncpa [#allocation9], 0 }
   0x3   :  { %15 = vsyncpa [#allocation4], 0  ;;  %s552_s24 = smov [#allocation5]   ;;  %s434_s28 = scalar_lea.hbm %s684_s1, 256 }
   0x4   :  { %s31_s25 = sshll.u32 %s552_s24, 4  ;;  %p435_p0 = scmp.ne.s32.totalorder %s684_s1, %s434_s28  ;;  %s32_s25 = int_to_ptr.vmem [resolvable:$true] %s31_s25 }
   0x5   :  { %p438_p1 = scmp.lt.u32.totalorder %s434_s28, %s684_s1 }
   0x7   :  { %p440_p2 = pnand %p438_p1, %p435_p0 }
   0x9   :  { %443 = shalt.err (!%p440_p2)
}
   0xa   :  { %s444_s10 = scalar_lea.vmem %s32_s25, 256  ;;  %p449_p4 = scmp.lt.s32.totalorder %s32_s25, %s32_s25 }
   0xb   :  { %p445_p3 = scmp.ne.s32.totalorder %s32_s25, %s444_s10  ;;  %p450_p5 = scmp.lt.s32.totalorder %s444_s10, %s444_s10 }
   0xd   :  { %p451_p6 = por %p450_p5, %p449_p4 }
   0xf   :  { %p452_p7 = pnand %p451_p6, %p445_p3 }
  0x11   :  { %455 = shalt.err (!%p452_p7)
}
  0x12   :  { %s553_s11 = smov 128   ;;  %s554_s12 = smov 8  }
  0x13   :  { %37 = dma.hbm_to_vmem [thread:$0]  %s684_s1, 256, %s32_s25, [#allocation6], %s553_s11, %s553_s11, %s554_s12  }
  0x14   :  { %s555_s15 = smov [#allocation2]   ;;  %s556_s17 = smov [#allocation7]  }
  0x15   :  { %s22_s16 = sshll.u32 %s555_s15, 4  ;;  %s45_s18 = sshll.u32 %s556_s17, 4  ;;  %s23_s16 = int_to_ptr.vmem [resolvable:$true] %s22_s16  ;;  %s46_s18 = int_to_ptr.vmem [resolvable:$true] %s45_s18 }
  0x16   :  { %s456_s21 = scalar_lea.hbm %s683_s0, 128 }
  0x17   :  { %p457_p8 = scmp.ne.s32.totalorder %s683_s0, %s456_s21  ;;  %p460_p9 = scmp.lt.u32.totalorder %s456_s21, %s683_s0 }
  0x19   :  { %p462_p10 = pnand %p460_p9, %p457_p8 }
  0x1b   :  { %465 = shalt.err (!%p462_p10)
}
  0x1c   :  { %s466_s1 = scalar_lea.vmem %s23_s16, 128  ;;  %p471_p12 = scmp.lt.s32.totalorder %s23_s16, %s23_s16 }
  0x1d   :  { %p467_p11 = scmp.ne.s32.totalorder %s23_s16, %s466_s1  ;;  %p472_p13 = scmp.lt.s32.totalorder %s466_s1, %s466_s1 }
  0x1f   :  { %p473_p0 = por %p472_p13, %p471_p12 }
  0x21   :  { %p474_p1 = pnand %p473_p0, %p467_p11 }
  0x23   :  { %477 = shalt.err (!%p474_p1)
}
  0x24   :  { %25 = dma.hbm_to_vmem [thread:$0]  %s683_s0, 128, %s23_s16, [#allocation3]  }
  0x25   :  { %s478_s30 = scalar_lea.hbm %s686_s3, 512 }
  0x26   :  { %p479_p2 = scmp.ne.s32.totalorder %s686_s3, %s478_s30  ;;  %p482_p3 = scmp.lt.u32.totalorder %s478_s30, %s686_s3 }
  0x28   :  { %p484_p4 = pnand %p482_p3, %p479_p2 }
  0x2a   :  { %487 = shalt.err (!%p484_p4)
}
  0x2b   :  { %s488_s14 = scalar_lea.vmem %s46_s18, 512  ;;  %p493_p6 = scmp.lt.s32.totalorder %s46_s18, %s46_s18 }
  0x2c   :  { %p489_p5 = scmp.ne.s32.totalorder %s46_s18, %s488_s14  ;;  %p494_p7 = scmp.lt.s32.totalorder %s488_s14, %s488_s14 }
  0x2e   :  { %p495_p8 = por %p494_p7, %p493_p6 }
  0x30   :  { %p496_p9 = pnand %p495_p8, %p489_p5 }
  0x32   :  { %499 = shalt.err (!%p496_p9)
}
  0x33   :  { %51 = dma.hbm_to_vmem [thread:$0]  %s686_s3, 512, %s46_s18, [#allocation6], %s553_s11, %s553_s11, %s554_s12  }
  0x34   :  { %s557_s16 = smov [#allocation8]   ;;  %s500_s21 = scalar_lea.hbm %s688_s5, 512 }
  0x35   :  { %s59_s17 = sshll.u32 %s557_s16, 4  ;;  %p501_p10 = scmp.ne.s32.totalorder %s688_s5, %s500_s21  ;;  %s60_s17 = int_to_ptr.vmem [resolvable:$true] %s59_s17 }
  0x36   :  { %p504_p11 = scmp.lt.u32.totalorder %s500_s21, %s688_s5 }
  0x38   :  { %p506_p12 = pnand %p504_p11, %p501_p10 }
  0x3a   :  { %509 = shalt.err (!%p506_p12)
}
  0x3b   :  { %s510_s1 = scalar_lea.vmem %s60_s17, 512  ;;  %p515_p0 = scmp.lt.s32.totalorder %s60_s17, %s60_s17 }
  0x3c   :  { %p511_p13 = scmp.ne.s32.totalorder %s60_s17, %s510_s1  ;;  %p516_p1 = scmp.lt.s32.totalorder %s510_s1, %s510_s1 }
  0x3e   :  { %p517_p2 = por %p516_p1, %p515_p0 }
  0x40   :  { %p518_p3 = pnand %p517_p2, %p511_p13 }
  0x42   :  { %521 = shalt.err (!%p518_p3)
}
  0x43   :  { %65 = dma.hbm_to_vmem [thread:$0]  %s688_s5, 512, %s60_s17, [#allocation9], %s553_s11, %s553_s11, %s554_s12  }
  0x44   :  { %544 = dma.done.wait [#allocation3], 128  }
  0x45   :  { %545 = vsyncadd [#allocation3], 4294967168 }
  0x46   :  { %546 = dma.done.wait [#allocation6], 768  }
  0x47   :  { %547 = vsyncadd [#allocation6], 4294966528 }
  0x48   :  { %548 = dma.done.wait [#allocation9], 512  }
  0x49   :  { %549 = vsyncadd [#allocation9], 4294966784  ;;  %v558_v0 = vmov 0.0|0.0   ;;  %vm559_vm0 = vmmov 0   ;;  %v560_v1 = vmov 0.0   ;;  %v81_v2 = vld [vmem:[#allocation5] sm:$0xff]  ;;  %v335_v28 = vlaneseq }
  0x4a   :  { %409 = vmatprep.subr.bf16.mxu0 %v558_v0  ;;  %384 = vmatprep.mubr.msk.f32.mxu0 %vm559_vm0, %v560_v1  ;;  %v82_v3 = vld [vmem:[#allocation5 + $0x8] sm:$0xff]  ;;  %v165_v5 = vld [vmem:[#allocation7] sm:$0xff]  ;;  %v166_v6 = vld [vmem:[#allocation7 + $0x8] sm:$0xff]  ;;  %vm90_vm1 = vcmask 130048   ;;  %vm176_vm2 = vcmask 261120   ;;  %s561_s28 = smov [#allocation10]  }
  0x4b   :  { %412 = vmatprep.subr.bf16.mxu1 %v558_v0  ;;  %395 = vmatprep.mubr.msk.f32.mxu1 %vm559_vm0, %v560_v1  ;;  %v410_v4 = vpack.c.bf16 %v82_v3, %v81_v2  ;;  %v413_v7 = vpack.c.bf16 %v166_v6, %v165_v5  ;;  %v80_v8 = vld [vmem:[#allocation2] sm:$0xff]  ;;  %v167_v9 = vld [vmem:[#allocation7 + $0x10] sm:$0xff]  ;;  %v168_v10 = vld [vmem:[#allocation7 + $0x18] sm:$0xff]  ;;  %v336_v29 = vand.u32 127, %v335_v28  ;;  %s350_s29 = sshll.u32 %s561_s28, 4  ;;  %s351_s29 = int_to_ptr.vmem [resolvable:$true] %s350_s29 }
  0x4c   :  { %v416_v11 = vpack.c.bf16 %v168_v10, %v167_v9  ;;  %v251_v12 = vld [vmem:[#allocation8] sm:$0xff]  ;;  %v252_v13 = vld [vmem:[#allocation8 + $0x8] sm:$0xff]  ;;  %v253_v20 = vld [vmem:[#allocation8 + $0x10] sm:$0xff]  ;;  %p527_p5 = scmp.lt.s32.totalorder %s351_s29, %s351_s29 }
  0x4d   :  { %411 = vmatpush3.bf16.msra.mxu0 %v410_v4  ;;  %414 = vmatpush3.bf16.msra.mxu1 %v413_v7  ;;  %v419_v14 = vpack.c.bf16 %v252_v13, %v251_v12  ;;  %v361_v15 = vld [vmem:[%s685_s2] ss:$0 sm:$0xff]  ;;  %v254_v21 = vld [vmem:[#allocation8 + $0x18] sm:$0xff]  ;;  %vm337_vm3 = vcmp.ge.s32.totalorder %v336_v29, 4  ;;  %vm338_vm4 = vcmp.lt.s32.totalorder %v336_v29, 8 }
  0x4e   :  { %418 = vmatprep.subr.bf16.mxu0 %v558_v0  ;;  %415 = vmatprep.subr.bf16.mxu1 %v558_v0  ;;  %v422_v22 = vpack.c.bf16 %v254_v21, %v253_v20  ;;  %v363_v23 = vld [vmem:[%s687_s4] ss:$0 sm:$0xff]  ;;  %vm339_vm5 = vmand %vm337_vm3, %vm338_vm4  ;;  %s522_s4 = scalar_lea.vmem %s351_s29, 128 }
  0x4f   :  { %v365_v30 = vld [vmem:[%s689_s6] ss:$0 sm:$0xff]  ;;  %p523_p4 = scmp.ne.s32.totalorder %s351_s29, %s522_s4  ;;  %p528_p6 = scmp.lt.s32.totalorder %s522_s4, %s522_s4 }
  0x50   :  { %385 = vmatmul.mubr.msk.f32.vlgmr.msra.gmra.mrb[0].mxu0 %vm90_vm1, %v80_v8 }
  0x51   :  { %406 = vmatprep.mubr.msk.f32.mxu0 %vm559_vm0, %v560_v1  ;;  %417 = vmatpush3.bf16.msra.mxu1 %v416_v11  ;;  %p529_p7 = por %p528_p6, %p527_p5 }
  0x52   :  { %420 = vmatpush3.bf16.msra.mxu0 %v419_v14 }
  0x53   :  { %421 = vmatprep.subr.bf16.mxu0 %v558_v0  ;;  %p530_p8 = pnand %p529_p7, %p523_p4 }
  0x56   :  { %423 = vmatpush3.bf16.msra.mxu0 %v422_v22 }
 0x123   :  { %v160_v16 = vpop.f32.mrb[0].mxu0 }
 0x124   :  { %v161_v17 = vadd.f32 %v361_v15, %v160_v16  ;;  %v386_v18 = vpop.f32.mrb[1].mxu0 }
 0x126   :  { %v164_v19 = vmax.f32 %v161_v17, 0.0 }
 0x128   :  { %396 = vmatmul.mubr.msk.f32.vlgmr.msra.gmra.mrb[0].mxu1 %vm176_vm2, %v164_v19 }
 0x1fb   :  { %v246_v24 = vpop.f32.mrb[0].mxu1 }
 0x1fc   :  { %v247_v25 = vadd.f32 %v363_v23, %v246_v24  ;;  %v397_v26 = vpop.f32.mrb[1].mxu1 }
 0x1fe   :  { %v250_v27 = vmax.f32 %v247_v25, 0.0 }
 0x200   :  { %407 = vmatmul.mubr.msk.f32.vlgmr.msra.gmra.mrb[2].mxu0 %vm176_vm2, %v250_v27 }
 0x2d3   :  { %v331_v31 = vpop.f32.mrb[2].mxu0 }
 0x2d4   :  { %v332_v32 = vadd.f32 %v365_v30, %v331_v31  ;;  %v408_v33 = vpop.f32.mrb[3].mxu0 }
 0x2d6   :  { %v340_v34 = vmax.f32 %v332_v32, -20.0 }
 0x2d8   :  { %v341_v35 = vmin.f32 %v340_v34, 2.0 }
 0x2da   :  { %v342_v36 = vsel %vm339_vm5, %v341_v35, %v332_v32 }
 0x2db   :  { %343 = vst [vmem:[#allocation10] sm:$0xff] %v342_v36 }
 0x2dc   :  { %533 = shalt.err (!%p530_p8)
}
 0x2dd   :  { %s534_s8 = scalar_lea.hbm %s690_s7, 128 }
 0x2de   :  { %p535_p9 = scmp.ne.s32.totalorder %s690_s7, %s534_s8  ;;  %p538_p10 = scmp.lt.u32.totalorder %s534_s8, %s690_s7 }
 0x2e0   :  { %p540_p11 = pnand %p538_p10, %p535_p9 }
 0x2e2   :  { %543 = shalt.err (!%p540_p11)
}
 0x2e3   :  { %353 = dma.vmem_to_hbm [thread:$0]  %s351_s29, 128, %s690_s7, [#allocation4]  }
 0x2e4   :  { %550 = dma.done.wait [#allocation4], 128  }
 0x2e5   :  { %551 = vsyncadd [#allocation4], 4294967168 }
 0x2e6   :  { %357 = vsyncpa [#allocation3], 1 }
 0x2e7   :  { %358 = vsyncpa [#allocation6], 1 }
 0x2e8   :  { %359 = vsyncpa [#allocation9], 1 }
 0x2e9   :  { %360 = vsyncpa [#allocation4], 1 }

</bundles_post_ra>
